<compile_context>
chip_gen: v7x
topology: tpu7x:2x2x1
jax: 0.10.0
libtpu: 0.0.40
codegen_flags: <defaults>
</compile_context>

<pallas_src>
import math
import functools

import jax
import jax.numpy as jnp
from jax.experimental import pallas as pl
from jax.experimental.pallas import tpu as pltpu


# ---------------------------------------------------------------------------
# Kernel 1: fused GroupNorm + SiLU (single-pass statistics)
# ---------------------------------------------------------------------------
def _gn_silu_kernel(x_ref, gamma_ref, beta_ref, o_ref, *, eps, inv_n):
    # x block: (1, 1, Cg, HW) = one (batch, group); gamma/beta block: (1, Cg, 1).
    x = x_ref[0, 0].astype(jnp.float32)                      # (Cg, HW)
    s1 = jnp.sum(x, keepdims=True)                           # (1, 1)
    s2 = jnp.sum(x * x, keepdims=True)                       # (1, 1)
    mean = s1 * inv_n
    var = jnp.maximum(s2 * inv_n - mean * mean, 0.0)
    rstd = jax.lax.rsqrt(var + eps)
    y = (x - mean) * rstd * gamma_ref[0] + beta_ref[0]       # per-channel affine
    o_ref[0, 0] = (y * jax.nn.sigmoid(y)).astype(o_ref.dtype)  # SiLU


def groupnorm_silu(x, gamma, beta, num_groups, *, eps=1e-5, out_dtype=jnp.bfloat16):
    B, C, H, W = x.shape
    G = num_groups
    Cg = C // G
    HW = H * W
    xg = x.reshape(B, G, Cg, HW)                 # row-major bitcast, no copy
    g = gamma.reshape(G, Cg, 1)
    b = beta.reshape(G, Cg, 1)

    out = pl.pallas_call(
        functools.partial(_gn_silu_kernel, eps=eps, inv_n=1.0 / (Cg * HW)),
        out_shape=jax.ShapeDtypeStruct((B, G, Cg, HW), out_dtype),
        grid=(B, G),
        in_specs=[
            pl.BlockSpec((1, 1, Cg, HW), lambda i, j: (i, j, 0, 0)),
            pl.BlockSpec((1, Cg, 1), lambda i, j: (j, 0, 0)),
            pl.BlockSpec((1, Cg, 1), lambda i, j: (j, 0, 0)),
        ],
        out_specs=pl.BlockSpec((1, 1, Cg, HW), lambda i, j: (i, j, 0, 0)),
        compiler_params=pltpu.CompilerParams(
            dimension_semantics=("parallel", "parallel")),
    )(xg, g, b)
    return out.reshape(B, C, H, W)


# ---------------------------------------------------------------------------
# Kernel 2: 3x3 / stride-2 "same" conv as a single K = 9*Cin+1 MXU matmul
# ---------------------------------------------------------------------------
def _conv_matmul_kernel(w_ref, taps_ref, o_ref):
    # w block: (Cout, K); taps block: (K, THW); out block: (Cout, THW).
    o_ref[...] = jnp.dot(
        w_ref[...], taps_ref[...], preferred_element_type=jnp.float32
    ).astype(o_ref.dtype)


def _same_pad(i, k, s, d=1):
    return max((math.ceil(i / s) - 1) * s + (k - 1) * d + 1 - i, 0)


def _round_up(a, m):
    return ((a + m - 1) // m) * m


def conv2d_same_s2(act, weight, bias, *, out_dtype, compute_dtype=jnp.bfloat16):
    """act: (B, Cin, H, W) normalized+activated; weight: (Cout, Cin, 3, 3)."""
    B, Cin, H, W = act.shape
    Cout = weight.shape[0]
    k, s = 3, 2
    ph, pw = _same_pad(H, k, s), _same_pad(W, k, s)
    ap = jnp.pad(act, ((0, 0), (0, 0),
                       (ph // 2, ph - ph // 2), (pw // 2, pw - pw // 2)))
    Hp, Wp = ap.shape[-2:]
    Ho, Wo = (Hp - k) // s + 1, (Wp - k) // s + 1
    HWo = Ho * Wo

    # Lane-dense tiling of the flattened (batch * output-pixel) column axis.
    THW = _round_up(HWo, 128)
    if THW > 512:
        THW = 512
    HWp_cols = _round_up(HWo, THW)
    n_tiles = HWp_cols // THW
    K = k * k * Cin + 1                                    # +1: bias folded in

    # Glue (pure layout, no extra activation round trip beyond this im2col):
    # 9 stride-2 shifted taps -> (9*Cin, B, HWo) -> pad columns -> add ones row.
    taps = jnp.stack(
        [ap[:, :, kh: kh + s * Ho: s, kw: kw + s * Wo: s]
         for kh in range(k) for kw in range(k)],
        axis=0)                                            # (9, B, Cin, Ho, Wo)
    taps = taps.transpose(0, 2, 1, 3, 4).reshape(k * k * Cin, B, HWo)
    taps = jnp.pad(taps, ((0, 0), (0, 0), (0, HWp_cols - HWo)))
    taps = jnp.concatenate(
        [taps.astype(compute_dtype),
         jnp.ones((1, B, HWp_cols), dtype=compute_dtype)], axis=0)
    taps = taps.reshape(K, B * HWp_cols)                   # (K, B*HWp_cols)

    # Weights (Cout, 9*Cin) + bias column, K-ordering = (kh*3 + kw)*Cin + c,
    # matching the taps row layout above.
    w2 = weight.transpose(0, 2, 3, 1).reshape(Cout, k * k * Cin)
    w_aug = jnp.concatenate([w2, bias[:, None]], axis=1).astype(compute_dtype)

    out = pl.pallas_call(
        _conv_matmul_kernel,
        out_shape=jax.ShapeDtypeStruct((Cout, B * HWp_cols), out_dtype),
        grid=(B, n_tiles),
        in_specs=[
            # constant index_map -> weights stay resident in VMEM across steps
            pl.BlockSpec((Cout, K), lambda b, j: (0, 0)),
            pl.BlockSpec((K, THW), lambda b, j: (0, b * n_tiles + j)),
        ],
        out_specs=pl.BlockSpec((Cout, THW), lambda b, j: (0, b * n_tiles + j)),
        compiler_params=pltpu.CompilerParams(
            dimension_semantics=("parallel", "parallel")),
    )(w_aug, taps)

    out = out.reshape(Cout, B, HWp_cols)[:, :, :HWo]
    return out.transpose(1, 0, 2).reshape(B, Cout, Ho, Wo)


# ---------------------------------------------------------------------------
# Downsample forward
# ---------------------------------------------------------------------------
def downsample_forward(x, params, *, compute_dtype=jnp.bfloat16):
    num_groups = params["num_groups"]
    act = groupnorm_silu(x, params["gn_gamma"], params["gn_beta"], num_groups,
                         out_dtype=compute_dtype)
    return conv2d_same_s2(act, params["conv_w"], params["conv_b"],
                          out_dtype=x.dtype, compute_dtype=compute_dtype)


# Pure-JAX reference for correctness checks.
def downsample_reference(x, params):
    B, C, H, W = x.shape
    G = params["num_groups"]
    xg = x.reshape(B, G, C // G, H * W).astype(jnp.float32)
    mean = jnp.mean(xg, axis=(2, 3), keepdims=True)
    var = jnp.mean((xg - mean) ** 2, axis=(2, 3), keepdims=True)
    xhat = ((xg - mean) * jax.lax.rsqrt(var + 1e-5)).reshape(B, C, H, W)
    y = xhat * params["gn_gamma"][None, :, None, None] + params["gn_beta"][None, :, None, None]
    a = y * jax.nn.sigmoid(y)
    ph, pw = _same_pad(H, 3, 2), _same_pad(W, 3, 2)
    out = jax.lax.conv_general_dilated(
        a, params["conv_w"],
        window_strides=(2, 2),
        padding=((ph // 2, ph - ph // 2), (pw // 2, pw - pw // 2)),
        dimension_numbers=("NCHW", "OIHW", "NCHW"),
    )
    return out + params["conv_b"][None, :, None, None]


if __name__ == "__main__":
    B, Cin, Cout, H, W = 2, 32, 32, 16, 16
    num_groups = Cin // 16

    key = jax.random.PRNGKey(0)
    kx, kg, kb, kw, kbias = jax.random.split(key, 5)
    x = jax.random.normal(kx, (B, Cin, H, W), dtype=jnp.float32)
    params = {
        "num_groups": num_groups,
        "gn_gamma": 1.0 + 0.1 * jax.random.normal(kg, (Cin,), dtype=jnp.float32),
        "gn_beta": 0.1 * jax.random.normal(kb, (Cin,), dtype=jnp.float32),
        "conv_w": 0.1 * jax.random.normal(kw, (Cout, Cin, 3, 3), dtype=jnp.float32),
        "conv_b": 0.1 * jax.random.normal(kbias, (Cout,), dtype=jnp.float32),
    }

    ref = jax.block_until_ready(downsample_reference(x, params))

    # Exact (f32-operand) path — tight check of the kernel logic.
    out_f32 = jax.block_until_ready(
        downsample_forward(x, params, compute_dtype=jnp.float32))
    assert out_f32.shape == (B, Cout, H // 2, W // 2), out_f32.shape
    assert jnp.allclose(out_f32, ref, rtol=1e-4, atol=1e-4), \
        float(jnp.max(jnp.abs(out_f32 - ref)))

    # Default fast path (bf16 MXU operands, f32 accumulation).
    out_bf16 = jax.block_until_ready(downsample_forward(x, params))
    assert out_bf16.shape == (B, Cout, H // 2, W // 2), out_bf16.shape
    assert jnp.allclose(out_bf16, ref, rtol=5e-2, atol=5e-2), \
        float(jnp.max(jnp.abs(out_bf16 - ref)))

    print("KERNEL_OK")
</pallas_src>

<mosaic_0001>
module attributes {stable_mosaic.version = 11 : i64} {
  func.func @_gn_silu_kernel(%arg0: i32, %arg1: i32, %arg2: memref<1x1x16x256xf32, #tpu.memory_space<vmem>>, %arg3: memref<1x16x1xf32, #tpu.memory_space<vmem>>, %arg4: memref<1x16x1xf32, #tpu.memory_space<vmem>>, %arg5: memref<1x1x16x256xf32, #tpu.memory_space<vmem>>) attributes {dimension_semantics = [#tpu.dimension_semantics<parallel>, #tpu.dimension_semantics<parallel>], iteration_bounds = array<i64: 2, 2>, scalar_prefetch = 0 : i64, scratch_operands = 0 : i64, tpu.core_type = #tpu.core_type<tc>, window_params = [{transform_indices = @transform_0, window_bounds = array<i64: 1, 1, 16, 256>}, {transform_indices = @transform_1, window_bounds = array<i64: 1, 16, 1>}, {transform_indices = @transform_2, window_bounds = array<i64: 1, 16, 1>}, {transform_indices = @transform_3, window_bounds = array<i64: 1, 1, 16, 256>}]} {
    %c0 = arith.constant 0 : index
    %c0_0 = arith.constant 0 : index
    %c0_1 = arith.constant 0 : index
    %c0_2 = arith.constant 0 : index
    %0 = vector.load %arg2[%c0, %c0_0, %c0_1, %c0_2] : memref<1x1x16x256xf32, #tpu.memory_space<vmem>>, vector<1x1x16x256xf32>
    %1 = vector.shape_cast %0 : vector<1x1x16x256xf32> to vector<16x256xf32>
    %2 = vector.shape_cast %1 : vector<16x256xf32> to vector<1x16x256xf32>
    %cst = arith.constant dense<0.000000e+00> : vector<1xf32>
    %3 = vector.multi_reduction <add>, %2, %cst [1, 2] : vector<1x16x256xf32> to vector<1xf32>
    %4 = vector.shape_cast %3 : vector<1xf32> to vector<1x1x1xf32>
    %5 = vector.extract %4[0, 0, 0] : f32 from vector<1x1x1xf32>
    %6 = vector.broadcast %5 : f32 to vector<1x1xf32>
    %7 = arith.mulf %1, %1 : vector<16x256xf32>
    %8 = vector.shape_cast %7 : vector<16x256xf32> to vector<1x16x256xf32>
    %cst_3 = arith.constant dense<0.000000e+00> : vector<1xf32>
    %9 = vector.multi_reduction <add>, %8, %cst_3 [1, 2] : vector<1x16x256xf32> to vector<1xf32>
    %10 = vector.shape_cast %9 : vector<1xf32> to vector<1x1x1xf32>
    %11 = vector.extract %10[0, 0, 0] : f32 from vector<1x1x1xf32>
    %12 = vector.broadcast %11 : f32 to vector<1x1xf32>
    %cst_4 = arith.constant 2.44140625E-4 : f32
    %13 = vector.broadcast %cst_4 : f32 to vector<1x1xf32>
    %14 = arith.mulf %6, %13 : vector<1x1xf32>
    %cst_5 = arith.constant 2.44140625E-4 : f32
    %15 = vector.broadcast %cst_5 : f32 to vector<1x1xf32>
    %16 = arith.mulf %12, %15 : vector<1x1xf32>
    %17 = arith.mulf %14, %14 : vector<1x1xf32>
    %18 = arith.subf %16, %17 : vector<1x1xf32>
    %cst_6 = arith.constant 0.000000e+00 : f32
    %19 = vector.broadcast %cst_6 : f32 to vector<1x1xf32>
    %20 = arith.maximumf %18, %19 : vector<1x1xf32>
    %cst_7 = arith.constant 9.99999974E-6 : f32
    %21 = vector.broadcast %cst_7 : f32 to vector<1x1xf32>
    %22 = arith.addf %20, %21 : vector<1x1xf32>
    %23 = math.rsqrt %22 : vector<1x1xf32>
    %24 = vector.broadcast %14 : vector<1x1xf32> to vector<16x256xf32>
    %25 = arith.subf %1, %24 : vector<16x256xf32>
    %26 = vector.broadcast %23 : vector<1x1xf32> to vector<16x256xf32>
    %27 = arith.mulf %25, %26 : vector<16x256xf32>
    %c0_8 = arith.constant 0 : index
    %c0_9 = arith.constant 0 : index
    %c0_10 = arith.constant 0 : index
    %28 = vector.load %arg3[%c0_8, %c0_9, %c0_10] : memref<1x16x1xf32, #tpu.memory_space<vmem>>, vector<1x16x1xf32>
    %29 = vector.shape_cast %28 : vector<1x16x1xf32> to vector<16x1xf32>
    %30 = vector.broadcast %29 : vector<16x1xf32> to vector<16x256xf32>
    %31 = arith.mulf %27, %30 : vector<16x256xf32>
    %c0_11 = arith.constant 0 : index
    %c0_12 = arith.constant 0 : index
    %c0_13 = arith.constant 0 : index
    %32 = vector.load %arg4[%c0_11, %c0_12, %c0_13] : memref<1x16x1xf32, #tpu.memory_space<vmem>>, vector<1x16x1xf32>
    %33 = vector.shape_cast %32 : vector<1x16x1xf32> to vector<16x1xf32>
    %34 = vector.broadcast %33 : vector<16x1xf32> to vector<16x256xf32>
    %35 = arith.addf %31, %34 : vector<16x256xf32>
    %36 = arith.negf %35 : vector<16x256xf32>
    %37 = math.exp %36 : vector<16x256xf32>
    %cst_14 = arith.constant 1.000000e+00 : f32
    %38 = vector.broadcast %cst_14 : f32 to vector<16x256xf32>
    %39 = arith.addf %38, %37 : vector<16x256xf32>
    %40 = arith.divf %38, %39 : vector<16x256xf32>
    %41 = arith.mulf %35, %40 : vector<16x256xf32>
    %c0_15 = arith.constant 0 : index
    %c0_16 = arith.constant 0 : index
    %c0_17 = arith.constant 0 : index
    %c0_18 = arith.constant 0 : index
    %42 = vector.load %arg5[%c0_15, %c0_16, %c0_17, %c0_18] : memref<1x1x16x256xf32, #tpu.memory_space<vmem>>, vector<1x1x16x256xf32>
    %43 = vector.shape_cast %42 : vector<1x1x16x256xf32> to vector<16x256xf32>
    %44 = vector.shape_cast %41 : vector<16x256xf32> to vector<1x1x16x256xf32>
    tpu.vector_store %arg5[%c0_15, %c0_16, %c0_17, %c0_18], %44 {strides = array<i32>} : memref<1x1x16x256xf32, #tpu.memory_space<vmem>>, vector<1x1x16x256xf32>,
    return
  }
  func.func @transform_0(%arg0: i32, %arg1: i32) -> (i32, i32, i32, i32) {
    %c0_i32 = arith.constant 0 : i32
    %c0_i32_0 = arith.constant 0 : i32
    %c0_i32_1 = arith.constant 0 : i32
    return %arg0, %arg1, %c0_i32, %c0_i32_0 : i32, i32, i32, i32
  }
  func.func @transform_1(%arg0: i32, %arg1: i32) -> (i32, i32, i32) {
    %c0_i32 = arith.constant 0 : i32
    %c0_i32_0 = arith.constant 0 : i32
    %c0_i32_1 = arith.constant 0 : i32
    return %arg1, %c0_i32, %c0_i32_0 : i32, i32, i32
  }
  func.func @transform_2(%arg0: i32, %arg1: i32) -> (i32, i32, i32) {
    %c0_i32 = arith.constant 0 : i32
    %c0_i32_0 = arith.constant 0 : i32
    %c0_i32_1 = arith.constant 0 : i32
    return %arg1, %c0_i32, %c0_i32_0 : i32, i32, i32
  }
  func.func @transform_3(%arg0: i32, %arg1: i32) -> (i32, i32, i32, i32) {
    %c0_i32 = arith.constant 0 : i32
    %c0_i32_0 = arith.constant 0 : i32
    %c0_i32_1 = arith.constant 0 : i32
    return %arg0, %arg1, %c0_i32, %c0_i32_0 : i32, i32, i32, i32
  }
}

</mosaic_0001>

<bundles_post_ra>
// kernel: tpu_custom_call.1
= control target key start
LH: loop header
LB: loop body
LE: loop exit
PB: predicated region body
PF: predicated region fallthrough
CT: control target
= control target key end

     0   :  { %8 = vsyncpa [#allocation3], 0  ;;  %s988_s0 = inlined_call_operand.hbm [shape: f32[2,2,16,256], index: 0, kind: input, shape index: {}]   ;;  %s989_s1 = inlined_call_operand.vmem [shape: f32[2,16,1], index: 1, kind: input, shape index: {}]   ;;  %s990_s2 = inlined_call_operand.vmem [shape: f32[2,16,1], index: 2, kind: input, shape index: {}]   ;;  %s991_s3 = inlined_call_operand.hbm [shape: f32[2,2,16,256], index: 3, kind: output, shape index: {}]  }
   0x1   :  { %10 = vsyncpa [#allocation3 + $0x1], 0 }
   0x2   :  { %11 = vsyncpa [#allocation4], 0 }
   0x3   :  { %13 = vsyncpa [#allocation4 + $0x1], 0  ;;  %s781_s12 = smov 0   ;;  %s783_s13 = smov 0  }
   0x4   :  { %s785_s14 = smov 0   ;;  %s787_s15 = smov 0  }
   0x5   :  { %s789_s16 = smov 0   ;;  %s791_s17 = smov 0  }
   0x6   :  { %s793_s18 = smov 0   ;;  %s795_s19 = smov 0  }
   0x7 LB: > { %s490_s20 = sadd.s32 4294967295, %s752_s19   ;;  %s491_s21 = sadd.s32 4294967294, %s752_s19   ;;  %s752_s19 = sphi %s795_s19, %s19_s19   ;;  %s748_s18 = sphi %s793_s18, %s1009_s18   ;;  %s744_s17 = sphi %s791_s17, %s1008_s17   ;;  %s740_s16 = sphi %s789_s16, %s1007_s16   ;;  %s736_s15 = sphi %s787_s15, %s1006_s15   ;;  %s732_s14 = sphi %s785_s14, %s1005_s14   ;;  %s728_s13 = sphi %s783_s13, %s1004_s13   ;;  %s724_s12 = sphi %s781_s12, %s1003_s12  }
   0x8   : > { %s28_s22 = sadd.s32 1, %s744_s17  ;;  %s31_s23 = sadd.s32 1, %s748_s18 }
   0x9   : > { %p29_p0 = scmp.ge.s32.totalorder %s28_s22, 2  ;;  %s40_s24 = sadd.s32 1, %s732_s14 }
   0xa   : > { %p47_p1 = scmp.ne.s32.totalorder %s732_s14, %s728_s13  ;;  %p48_p2 = scmp.eq.s32.totalorder %s752_s19, 0 }
   0xb   : > { %s1011_s22 = smov (%p29_p0, %s28_s22), 0  ;;  %s1013_s23 = smov (!%p29_p0, %s31_s23), %s748_s18 }
   0xc   : > { %s36_s25 = ssub.s32 %s744_s17, %s1011_s22  ;;  %p834_p3 = por %p48_p2, %p47_p1 }
   0xd   : > { %p33_p4 = scmp.ge.s32.totalorder %s1013_s23, 2  ;;  %p53_p5 = scmp.ne.s32.totalorder %s728_s13, %s724_s12 }
   0xe   : > { %p54_p6 = scmp.eq.s32.totalorder %s490_s20, 0  ;;  %p131_p7 = scmp.eq.s32.totalorder %s490_s20, 3 }
   0xf   : > { %s1015_s23 = smov (%p33_p4, %s1013_s23), 0  ;;  %p137_p10 = scmp.eq.s32.totalorder %s491_s21, 3 }
  0x10   : > { %995 = sst [smem:[#allocation8_spill]] %s1015_s23  ;;  %p842_p8 = por %p54_p6, %p53_p5 }
  0x11   : > { %p846_p9 = por %p131_p7, %p47_p1  ;;  %s35_s29 = ssub.s32 %s748_s18, %s1015_s23 }
  0x12   : > { %s37_s30 = sor.u32 %s36_s25, %s35_s29  ;;  %p852_p12 = por %p137_p10, %p53_p5 }
  0x13   : > { %s997_s28 = scalar_select %p846_p9, 1, 0 }
  0x14   : > { %p38_p11 = scmp.eq.s32.totalorder %s37_s30, 0  ;;  %p533_p13 = scmp.lt.s32.totalorder %s752_s19, 4 }
  0x15   : > { %s998_s4 = scalar_select %p852_p12, 1, 0 }
  0x16   : > { %s157_s5 = sand.u32 1, %s732_s14   ;;  %s495_s8 = sshll.u32 %s744_s17, 2 }
  0x17   : > { %s859_s6 = scalar_select %p38_p11, %s732_s14, %s40_s24  }
  0x18   : > { %s494_s7 = sshll.u32 %s157_s5, 5  ;;  %s496_s9 = sshll.u32 %s748_s18, 3 }
  0x19   : > { %s161_s10 = scalar_lea.vmem [#allocation2], %s494_s7  ;;  %s167_s20 = sadd.s32 %s496_s9, %s495_s8 }
  0x1a   : > { %s170_s11 = sshll.u32 %s161_s10, 4  ;;  %s497_s23 = sshll.u32 %s167_s20, 7  ;;  %s863_s11 = int_to_ptr.vmem [resolvable:$true] %s170_s11 }
  0x1b   : > { %p867_p0 = pnand %p533_p13, %p834_p3  ;;  %s874_s24 = scalar_lea.hbm %s988_s0, %s497_s23 }
  0x1c   : > { %s876_s30 = scalar_lea.sflag [#allocation3], %s157_s5  ;;  %s624_s7 = scalar_lea.hbm %s874_s24, 512 }
  0x1d   : > { %p625_p1 = scmp.ne.s32.totalorder %s874_s24, %s624_s7  ;;  %p626_p2 = pneg %p867_p0 }
  0x1e   : > { %s629_s9 = scalar_lea.hbm %s988_s0, 2048  ;;  %p630_p5 = scmp.lt.u32.totalorder %s874_s24, %s988_s0 }
  0x1f   : > { %p627_p3 = pnand %p626_p2, %p625_p1  ;;  %p631_p6 = scmp.lt.u32.totalorder %s629_s9, %s624_s7 }
  0x20   : > { %p633_p10 = scmp.lt.u32.totalorder %s624_s7, %s874_s24 }
  0x21   : > { %p628_p4 = pneg %p627_p3  ;;  %p632_p7 = por %p631_p6, %p630_p5 }
  0x23   : > { %p634_p11 = por %p633_p10, %p632_p7 }
  0x25   : > { %p635_p13 = pnand %p634_p11, %p628_p4 }
  0x27   : > { %638 = shalt.err (!%p635_p13)
}
  0x28   : > { %s639_s5 = scalar_lea.vmem %s863_s11, 512  ;;  %s754_s20 = smov [#allocation2]  }
  0x29   : > { %p640_p1 = scmp.ne.s32.totalorder %s863_s11, %s639_s5  ;;  %s644_s25 = sshll.u32 %s754_s20, 4  ;;  %s645_s25 = int_to_ptr.vmem [resolvable:$false] %s644_s25 }
  0x2a   : > { %s646_s29 = scalar_lea.vmem %s645_s25, 1024  ;;  %p647_p9 = scmp.lt.s32.totalorder %s863_s11, %s645_s25 }
  0x2b   : > { %p642_p3 = pnand %p640_p1, %p626_p2  ;;  %p648_p5 = scmp.lt.s32.totalorder %s646_s29, %s639_s5 }
  0x2d   : > { %p643_p12 = pneg %p642_p3  ;;  %p649_p6 = por %p648_p5, %p647_p9 }
  0x2f   : > { %p650_p7 = pnand %p649_p6, %p643_p12 }
  0x31   : > { %653 = shalt.err (!%p650_p7)
}
  0x32   : > { %s755_s7 = smov 256   ;;  %s756_s26 = smov 16  }
  0x33   : > { %528 = dma.hbm_to_vmem [thread:$0]  (!%p867_p0), %s874_s24, 512, %s863_s11, %s876_s30, %s755_s7, %s755_s7, %s756_s26  }
  0x34   : > { %p498_p2 = scmp.ge.s32.totalorder %s752_s19, 1  ;;  %p194_p4 = scmp.lt.s32.totalorder %s752_s19, 5 }
  0x36   : > { %p195_p10 = pnand %p498_p2, %p194_p4 }
  0x37   : > { %s907_s8 = sand.u32 (!%p195_p10), 1, %s728_s13  }
  0x38   : > { %198 = sbr.rel (%p195_p10) target bundleno = 351 (0x15f), region = 32  ;;  %s499_s9 = sshll.u32 (!%p195_p10), %s907_s8, 5 }
  0x39   : > { %s201_s23 = scalar_lea.sflag (!%p195_p10), [#allocation3], %s907_s8  ;;  %s204_s10 = scalar_lea.vmem (!%p195_p10), [#allocation2], %s499_s9 }
  0x3f   : > { %715 = dma.done.wait (%p842_p8), %s201_s23, 512  }
  0x40   : > { %717 = vsyncadd (%p842_p8), %s201_s23, 4294966784  ;;  %p237_p9 = scmp.lt.s32.totalorder %s736_s15, 1  ;;  %v757_v0 = vmov 0   ;;  %v247_v1 = vld [vmem:[%s204_s10] sm:$0xff]  ;;  %v248_v2 = vld [vmem:[%s204_s10 + $0x8] sm:$0xff]  ;;  %s510_s26 = sshll.u32 %s736_s15, 2 }
  0x41   : > { %604 = vset.pattern.permute.xlu1 %v757_v0  ;;  %605 = vset.pattern.permute.xlu0 %v757_v0  ;;  %v249_v3 = vld [vmem:[%s204_s10 + $0x10] sm:$0xff]  ;;  %v251_v4 = vadd.f32 %v248_v2, %v247_v1  ;;  %v264_v5 = vmul.f32 %v247_v1, %v247_v1  ;;  %v265_v6 = vmul.f32 %v248_v2, %v248_v2  ;;  %v250_v9 = vld [vmem:[%s204_s10 + $0x18] sm:$0xff]  ;;  %s511_s23 = sshll.u32 %s740_s16, 3  ;;  %s361_s30 = scalar_lea.sflag [#allocation4], %s907_s8 }
  0x42   : > { %s238_s11 = scalar_select %p237_p9, %s736_s15, 1  ;;  %v266_v7 = vmul.f32 %v249_v3, %v249_v3  ;;  %v267_v11 = vmul.f32 %v250_v9, %v250_v9 }
  0x43   : > { %v252_v10 = vadd.f32 %v251_v4, %v249_v3  ;;  %v268_v12 = vadd.f32 %v265_v6, %v264_v5  ;;  %s373_s10 = sadd.s32 %s511_s23, %s510_s26  ;;  %p1000_p12 = scmp.ne.s32.totalorder %s997_s28, 0 }
  0x44   : > { %s515_s21 = sshll.u32 %s238_s11, 4  ;;  %s236_s11 = scalar_lea.vmem [#allocation5], %s499_s9 }
  0x45   : > { %s241_s5 = scalar_lea.vmem %s989_s1, %s515_s21  ;;  %s246_s25 = scalar_lea.vmem %s990_s2, %s515_s21  ;;  %v253_v14 = vadd.f32 %v252_v10, %v250_v9  ;;  %v269_v15 = vadd.f32 %v268_v12, %v266_v7 }
  0x46   : > { %v296_v8 = vld [vmem:[%s241_s5] sm:$0xff]  ;;  %v297_v13 = vld [vmem:[%s241_s5 + $0x8] sm:$0xff]  ;;  %s376_s21 = sshll.u32 %s236_s11, 4  ;;  %s512_s24 = sshll.u32 %s373_s10, 7  ;;  %s929_s21 = int_to_ptr.vmem [resolvable:$true] %s376_s21 }
  0x47   : > { %300 = vperm.xlu1 %604, %v296_v8   ;;  %254 = vadd.xlane.f32.xlu0 %v253_v14  ;;  %v270_v16 = vadd.f32 %v269_v15, %v267_v11  ;;  %v313_v17 = vld [vmem:[%s246_s25 + $0x8] sm:$0xff]  ;;  %v312_v18 = vld [vmem:[%s246_s25] sm:$0xff]  ;;  %s934_s9 = scalar_lea.hbm %s991_s3, %s512_s24  ;;  %s654_s5 = scalar_lea.vmem %s929_s21, 512 }
  0x48   : > { %p655_p8 = scmp.ne.s32.totalorder %s929_s21, %s654_s5  ;;  %s758_s27 = smov [#allocation5]  }
  0x49   : > { %s658_s20 = sshll.u32 %s758_s27, 4  ;;  %s659_s20 = int_to_ptr.vmem [resolvable:$false] %s658_s20 }
  0x4a   : > { %p656_p0 = pnand %p655_p8, %p1000_p12  ;;  %s660_s25 = scalar_lea.vmem %s659_s20, 1024 }
  0x4b   : > { %305 = vperm.xlu1 %604, %v297_v13   ;;  %271 = vadd.xlane.f32.xlu0 %v270_v16  ;;  %p661_p13 = scmp.lt.s32.totalorder %s929_s21, %s659_s20  ;;  %p662_p1 = scmp.lt.s32.totalorder %s660_s25, %s654_s5 }
  0x4c   : > { %p657_p11 = pneg %p656_p0 }
  0x4d   : > { %p663_p3 = por %p662_p1, %p661_p13 }
  0x4f   : > { %321 = vperm.xlu1 %604, %v313_v17   ;;  %p664_p5 = pnand %p663_p3, %p657_p11 }
  0x61   : > { %316 = vperm.xlu0 %605, %v312_v18  }
  0xc6   : > { %v301_v41 = vpop.permute.xlu1 %300 }
  0xca   : > { %v306_v42 = vpop.permute.xlu1 %305 }
  0xce   : > { %v322_v57 = vpop.permute.xlu1 %321 }
  0xd4   : > { %v255_v19 = vpop.xlane.xlu0 %254 }
  0xd5   : > { %v256_v20 = vrot.slane %v255_v19, 4 }
  0xd7   : > { %v257_v21 = vadd.f32 %v256_v20, %v255_v19 }
  0xd8   : > { %v272_v22 = vpop.xlane.xlu0 %271 }
  0xd9   : > { %v258_v23 = vrot.slane %v257_v21, 2  ;;  %v273_v24 = vrot.slane %v272_v22, 4 }
  0xdb   : > { %v274_v25 = vadd.f32 %v273_v24, %v272_v22  ;;  %v259_v26 = vadd.f32 %v258_v23, %v257_v21 }
  0xdd   : > { %v275_v27 = vrot.slane %v274_v25, 2  ;;  %v260_v28 = vrot.slane %v259_v26, 1 }
  0xdf   : > { %v261_v29 = vadd.f32 %v260_v28, %v259_v26  ;;  %v276_v30 = vadd.f32 %v275_v27, %v274_v25 }
  0xe0   : > { %v317_v52 = vpop.permute.xlu0 %316 }
  0xe1   : > { %517 = vpush %v261_v29  ;;  %v277_v31 = vrot.slane %v276_v30, 1 }
  0xe3   : > { %v278_v32 = vadd.f32 %v277_v31, %v276_v30 }
  0xe5   : > { %519 = vpush %v278_v32 }
 0x112   : > { %s518_s29 = spop %517 }
 0x113   : > { %v263_v33 = vstv %s518_s29 }
 0x114   : > { %v281_v34 = vmul.f32 0.00024414063, %v263_v33 }
 0x116   : > { %s520_s7 = spop %519  ;;  %v283_v37 = vmul.f32 %v281_v34, %v281_v34  ;;  %v288_v43 = vsub.f32 %v247_v1, %v281_v34  ;;  %v289_v44 = vsub.f32 %v248_v2, %v281_v34  ;;  %v290_v45 = vsub.f32 %v249_v3, %v281_v34 }
 0x117   : > { %v280_v35 = vstv %s520_s7  ;;  %v291_v46 = vsub.f32 %v250_v9, %v281_v34 }
 0x118   : > { %v282_v36 = vmul.f32 0.00024414063, %v280_v35 }
 0x11a   : > { %v284_v38 = vsub.f32 %v282_v36, %v283_v37 }
 0x11c   : > { %v285_v39 = vmax.f32 %v284_v38, 0.0 }
 0x11e   : > { %v286_v40 = vadd.f32 1e-05, %v285_v39 }
 0x120   : > { %606 = vrsqrt.f32 %v286_v40 }
 0x12a   : > { %v607_v47 = vpop.eup %606 }
 0x12b   : > { %v292_v48 = vmul.f32 %v607_v47, %v288_v43  ;;  %v293_v49 = vmul.f32 %v607_v47, %v289_v44  ;;  %v294_v50 = vmul.f32 %v607_v47, %v290_v45  ;;  %v295_v51 = vmul.f32 %v607_v47, %v291_v46 }
 0x12d   : > { %v308_v53 = vmul.f32 %v301_v41, %v292_v48  ;;  %v309_v54 = vmul.f32 %v301_v41, %v293_v49  ;;  %v310_v55 = vmul.f32 %v306_v42, %v294_v50  ;;  %v311_v56 = vmul.f32 %v306_v42, %v295_v51 }
 0x12f   : > { %v326_v58 = vadd.f32 %v322_v57, %v310_v55  ;;  %v327_v59 = vadd.f32 %v322_v57, %v311_v56  ;;  %v324_v60 = vadd.f32 %v317_v52, %v308_v53  ;;  %v325_v61 = vadd.f32 %v317_v52, %v309_v54 }
 0x131   : > { %v507_v62 = vmul.f32 -1.442695, %v326_v58  ;;  %v508_v63 = vmul.f32 -1.442695, %v327_v59  ;;  %v505_v0 = vmul.f32 -1.442695, %v324_v60 }
 0x132   : > { %v506_v1 = vmul.f32 -1.442695, %v325_v61 }
 0x133   : > { %608 = vpow2.f32 %v507_v62 }
 0x134   : > { %610 = vpow2.f32 %v508_v63 }
 0x135   : > { %612 = vpow2.f32 %v505_v0 }
 0x136   : > { %614 = vpow2.f32 %v506_v1 }
 0x13d   : > { %v609_v2 = vpop.eup %608 }
 0x13e   : > { %v611_v3 = vpop.eup %610  ;;  %v342_v4 = vadd.f32 1.0, %v609_v2 }
 0x13f   : > { %v613_v5 = vpop.eup %612  ;;  %v343_v6 = vadd.f32 1.0, %v611_v3 }
 0x140   : > { %v615_v7 = vpop.eup %614  ;;  %616 = vrcp.f32 %v342_v4  ;;  %v340_v8 = vadd.f32 1.0, %v613_v5 }
 0x141   : > { %618 = vrcp.f32 %v343_v6  ;;  %v341_v9 = vadd.f32 1.0, %v615_v7 }
 0x142   : > { %620 = vrcp.f32 %v340_v8 }
 0x143   : > { %622 = vrcp.f32 %v341_v9 }
 0x14a   : > { %v617_v10 = vpop.eup %616 }
 0x14b   : > { %v619_v11 = vpop.eup %618  ;;  %v354_v12 = vmul.f32 %v617_v10, %v326_v58 }
 0x14c   : > { %v621_v13 = vpop.eup %620  ;;  %v355_v14 = vmul.f32 %v619_v11, %v327_v59 }
 0x14d   : > { %v623_v15 = vpop.eup %622  ;;  %358 = vst [vmem:[%s236_s11 + $0x10] sm:$0xff] %v354_v12  ;;  %v352_v16 = vmul.f32 %v621_v13, %v324_v60 }
 0x14e   : > { %359 = vst [vmem:[%s236_s11 + $0x18] sm:$0xff] %v355_v14  ;;  %v353_v17 = vmul.f32 %v623_v15, %v325_v61 }
 0x14f   : > { %356 = vst [vmem:[%s236_s11] sm:$0xff] %v352_v16 }
 0x150   : > { %357 = vst [vmem:[%s236_s11 + $0x8] sm:$0xff] %v353_v17 }
 0x151   : > { %667 = shalt.err (!%p664_p5)
}
 0x152   : > { %s668_s29 = scalar_lea.hbm %s934_s9, 512  ;;  %s672_s23 = scalar_lea.hbm %s991_s3, 2048 }
 0x153   : > { %p669_p6 = scmp.ne.s32.totalorder %s934_s9, %s668_s29  ;;  %p673_p4 = scmp.lt.u32.totalorder %s934_s9, %s991_s3 }
 0x154   : > { %p674_p10 = scmp.lt.u32.totalorder %s672_s23, %s668_s29  ;;  %p676_p8 = scmp.lt.u32.totalorder %s668_s29, %s934_s9 }
 0x155   : > { %p670_p7 = pnand %p669_p6, %p1000_p12 }
 0x156   : > { %p675_p9 = por %p674_p10, %p673_p4 }
 0x157   : > { %p671_p2 = pneg %p670_p7 }
 0x158   : > { %p677_p0 = por %p676_p8, %p675_p9 }
 0x15a   : > { %p678_p11 = pnand %p677_p0, %p671_p2 }
 0x15c   : > { %681 = shalt.err (!%p678_p11)
}
 0x15d   : > { %s759_s24 = smov 256   ;;  %s760_s15 = smov 16  }
 0x15e   : > { %523 = dma.vmem_to_hbm [thread:$0]  (%p1000_p12), %s929_s21, 512, %s934_s9, %s361_s30, %s759_s24, %s759_s24, %s760_s15  }
 0x15f PF: > { %p534_p13 = scmp.ge.s32.totalorder %s752_s19, 2  ;;  %s391_s16 = sand.u32 1, %s724_s12  }
 0x160   : > { %p1001_p1 = scmp.ne.s32.totalorder %s998_s4, 0  ;;  %s392_s5 = scalar_lea.sflag [#allocation4], %s391_s16 }
 0x162   : > { %p530_p3 = pnand %p534_p13, %p1001_p1 }
 0x164   : > { %719 = dma.done.wait (!%p530_p3), %s392_s5, 512  }
 0x165   : > { %721 = vsyncadd (!%p530_p3), %s392_s5, 4294966784  ;;  %s19_s19 = sadd.s32 1, %s752_s19   ;;  %s1002_s28 = sld [smem:[#allocation8_spill]] }
 0x166   : > { %p16_p5 = scmp.ge.s32.totalorder %s19_s19, 6   ;;  %s1003_s12 = smov %s728_s13 }
 0x167   : > { %s1004_s13 = smov %s732_s14  ;;  %s1005_s14 = smov %s859_s6 }
 0x168   : > { %s1006_s15 = smov %s744_s17  ;;  %s1007_s16 = smov %s748_s18 }
 0x169   : > { %s1008_s17 = smov %s1011_s22  ;;  %18 = sbr.rel (!%p16_p5) target bundleno = 7 (0x7), region = 83 }
 0x16b   : > { %s1009_s18 = smov %s1002_s28 }
 0x170   :  { %397 = vsyncpa [#allocation3], 1 }
 0x171   :  { %399 = vsyncpa [#allocation3 + $0x1], 1 }
 0x172   :  { %400 = vsyncpa [#allocation4], 1 }
 0x173   :  { %402 = vsyncpa [#allocation4 + $0x1], 1 }

</bundles_post_ra>
